<compile_context>
chip_gen: v7x
topology: tpu7x:2x2x1
jax: 0.10.0
libtpu: 0.0.40
codegen_flags: <defaults>
</compile_context>

<pallas_src>
import jax
import jax.numpy as jnp
from jax.experimental import pallas as pl
from jax.experimental.pallas import tpu as pltpu


def _round_up(x, m):
    return ((x + m - 1) // m) * m


def _cdiv(a, b):
    return (a + b - 1) // b


def _make_kernel(n_pred, inv_n_pred):
    """Kernel over grid (row_tiles,); pred inputs are unrolled inside the body."""

    def kernel(*refs):
        sal_ref = refs[0]
        x_refs = refs[1:1 + n_pred]
        w1t_ref, b1t_ref, w2_ref, b2_ref, out_ref = refs[1 + n_pred:]

        w1t = w1t_ref[...]          # (H, D)  f32
        b1t = b1t_ref[...]          # (H, 1)  f32
        w2r = w2_ref[...]           # (1, H)  f32
        b2 = b2_ref[...]            # (1, 1)  f32

        acc = None
        for x_ref in x_refs:        # unrolled static loop over selected inputs
            x = x_ref[...]                                  # (tm, D) native dtype
            if x.dtype != jnp.float32:
                x = x.astype(jnp.float32)                   # in-VMEM upcast (VPU)
            # Layer 1 on MXU, lane-dense (H, tm) activation (contract D with D).
            h = jax.lax.dot_general(
                w1t, x, dimension_numbers=(((1,), (1,)), ((), ())),
                preferred_element_type=jnp.float32)         # (H, tm)
            h = jnp.maximum(h + b1t, 0.0)                   # bias + ReLU
            # Layer 2 (H -> 1): canonical (1,H) @ (H,tm) -> lane-dense (1, tm).
            logit = jax.lax.dot_general(
                w2r, h, dimension_numbers=(((1,), (0,)), ((), ())),
                preferred_element_type=jnp.float32)         # (1, tm)
            s = jax.nn.sigmoid(logit + b2)
            acc = s if acc is None else acc + s

        mask = jnp.where(sal_ref[...] >= 0, 1.0, 0.0)       # (1, tm) f32
        if n_pred > 1:
            mask = mask * inv_n_pred
        out_ref[...] = acc * mask                           # single fused store

    return kernel


def saliency_head_forward(inputs, saliency, params, pred_indices=(-1,), tm=8192):
    """JAX/Pallas equivalent of SaliencyHead.forward (mode='test').

    inputs: list of (B, L, D) arrays (any float dtype, fed natively);
    saliency: (B, L) array.  Returns averaged saliency prediction, (B, L) f32.
    """
    w1, b1, w2, b2 = params
    n_inputs = len(inputs)
    pred_idx = sorted({idx % n_inputs for idx in pred_indices})
    n_pred = len(pred_idx)

    B, L = saliency.shape
    M = B * L
    D = inputs[0].shape[-1]
    H = w1.shape[1]
    lane = 128

    # ---- row tile selection -------------------------------------------------
    # Per-row VMEM cost of the x streams: double-buffered, lane-padded to 128.
    x_row_bytes = sum(
        2 * _round_up(D, lane) * jnp.dtype(inputs[i].dtype).itemsize
        for i in pred_idx)
    VMEM_X_BUDGET = 40 << 20          # conservative across v5e/v6e/v7x
    tm_cap = max(lane, (VMEM_X_BUDGET // max(x_row_bytes, 1)) // lane * lane)
    tm_req = max(lane, min(int(tm), tm_cap, _round_up(M, lane)))

    G = _cdiv(M, tm_req)
    if G == 1 and M >= 2 * lane:
        G = 2                          # let the "parallel" axis split across 2 TCs (v7x)
    tm_eff = _round_up(_cdiv(M, G), lane)   # balanced tiles: <~128 rows waste per tile
    G = _cdiv(M, tm_eff)
    M_pad = G * tm_eff

    # ---- params: zero-column elision + transposed layer-1 weight ------------
    # The appended zero column only multiplies w1[D, :] -> drop it; pre-transpose
    # w1 so the kernel's layer-1 output is lane-dense (H, tm).
    w1_t = jnp.asarray(w1[:D, :].T, dtype=jnp.float32)         # (H, D)
    b1_t = jnp.asarray(b1, dtype=jnp.float32).reshape(H, 1)    # (H, 1)
    w2_row = jnp.asarray(w2, dtype=jnp.float32).reshape(1, H)  # (1, H)
    b2_f = jnp.asarray(b2, dtype=jnp.float32).reshape(1, 1)    # (1, 1)

    # ---- operands: no HBM copies of x (no stack, no pad); views only --------
    xs = [inputs[i].reshape(M, D) for i in pred_idx]           # native dtype
    sal = saliency.reshape(M).astype(jnp.float32)
    if M_pad != M:
        # Only the tiny saliency array is padded (mask=0 on pad rows); padded
        # output lanes are sliced off below, so garbage x tail rows are inert.
        sal = jnp.pad(sal, (0, M_pad - M), constant_values=-1.0)
    sal = sal.reshape(G, tm_eff)                               # lane-dense rows

    kernel = _make_kernel(n_pred, 1.0 / n_pred)

    in_specs = (
        [pl.BlockSpec((1, tm_eff), lambda i: (i, 0))]                    # saliency
        + [pl.BlockSpec((tm_eff, D), lambda i: (i, 0)) for _ in range(n_pred)]
        + [pl.BlockSpec((H, D), lambda i: (0, 0)),                       # w1^T
           pl.BlockSpec((H, 1), lambda i: (0, 0)),                       # b1^T
           pl.BlockSpec((1, H), lambda i: (0, 0)),                       # w2 row
           pl.BlockSpec((1, 1), lambda i: (0, 0))])                      # b2

    # ---- VMEM footprint estimate (lane padding of narrow D/H included) ------
    x_vmem = tm_eff * x_row_bytes                       # double-buffered x streams
    h_vmem = n_pred * _round_up(H, 8) * tm_eff * 4      # (H, tm) f32 activations
    io_vmem = 2 * 2 * 8 * tm_eff * 4                    # sal + out, double-buffered
    vmem_limit = int(min(max(x_vmem + h_vmem + io_vmem + (8 << 20), 32 << 20),
                         48 << 20))

    flops = 2 * n_pred * M * (D * H + H)
    transcend = n_pred * M
    bytes_acc = int(sum(M * D * jnp.dtype(inputs[i].dtype).itemsize
                        for i in pred_idx) + 8 * M)

    out = pl.pallas_call(
        kernel,
        out_shape=jax.ShapeDtypeStruct((G, tm_eff), jnp.float32),
        grid_spec=pltpu.PrefetchScalarGridSpec(
            num_scalar_prefetch=0,
            grid=(G,),
            in_specs=in_specs,
            out_specs=pl.BlockSpec((1, tm_eff), lambda i: (i, 0)),
        ),
        compiler_params=pltpu.CompilerParams(
            dimension_semantics=("parallel",),
            vmem_limit_bytes=vmem_limit),
        cost_estimate=pl.CostEstimate(
            flops=flops, transcendentals=transcend, bytes_accessed=bytes_acc),
    )(sal, *xs, w1_t, b1_t, w2_row, b2_f)

    return out.reshape(M_pad)[:M].reshape(B, L)


def init_params(key, d_in, hidden):
    """Deterministic params for Linear(d_in, hidden) -> ReLU -> Linear(hidden, 1)."""
    k1, k2, k3, k4 = jax.random.split(key, 4)
    bound1 = 1.0 / jnp.sqrt(d_in)
    bound2 = 1.0 / jnp.sqrt(hidden)
    w1 = jax.random.uniform(k1, (d_in, hidden), jnp.float32, -bound1, bound1)
    b1 = jax.random.uniform(k2, (1, hidden), jnp.float32, -bound1, bound1)
    w2 = jax.random.uniform(k3, (hidden, 1), jnp.float32, -bound2, bound2)
    b2 = jax.random.uniform(k4, (1, 1), jnp.float32, -bound2, bound2)
    return (w1, b1, w2, b2)


def _reference_forward(inputs, saliency, params, pred_indices=(-1,)):
    """Plain-JAX reference mirroring the PyTorch module (incl. zero column)."""
    w1, b1, w2, b2 = params
    n_inputs = len(inputs)
    pred_idx = sorted({idx % n_inputs for idx in pred_indices})
    mask = jnp.where(saliency >= 0, 1.0, 0.0).astype(jnp.float32)
    out = []
    for i in pred_idx:
        x = inputs[i].astype(jnp.float32)
        zero_col = jnp.zeros(x.shape[:-1] + (1,), dtype=x.dtype)
        xp = jnp.concatenate([x, zero_col], axis=-1)
        h = jnp.maximum(xp @ w1 + b1[0], 0.0)
        logit = (h @ w2 + b2[0])[..., 0]
        out.append(jax.nn.sigmoid(logit) * mask)
    return sum(out) / len(out)


if __name__ == "__main__":
    # Small shapes: batch=2, seq=8, feature dim=32, hidden=32.
    # dims for build_linear_modules corresponds to [D+1, H, 1] = [33, 32, 1].
    B, L, D, H = 2, 8, 32, 32
    N_INPUTS = 2

    key = jax.random.PRNGKey(0)
    k_params, k_sal, *k_inputs = jax.random.split(key, 2 + N_INPUTS)

    params = init_params(k_params, D + 1, H)
    inputs = [jax.random.normal(k, (B, L, D), dtype=jnp.float32)
              for k in k_inputs]
    # saliency labels with some negative entries to exercise the mask
    saliency = jax.random.normal(k_sal, (B, L), dtype=jnp.float32)

    # Case 1: default pred_indices=(-1,)  (single-store specialized path)
    res1 = jax.block_until_ready(
        saliency_head_forward(inputs, saliency, params, pred_indices=(-1,)))
    ref1 = _reference_forward(inputs, saliency, params, pred_indices=(-1,))
    assert res1.shape == (B, L)
    assert jnp.allclose(res1, ref1, atol=1e-4, rtol=1e-4), "case1 mismatch"

    # Case 2: fused multi-pred averaging (two input operands, unrolled in-kernel)
    res2 = jax.block_until_ready(
        saliency_head_forward(inputs, saliency, params, pred_indices=(0, -1)))
    ref2 = _reference_forward(inputs, saliency, params, pred_indices=(0, -1))
    assert jnp.allclose(res2, ref2, atol=1e-4, rtol=1e-4), "case2 mismatch"

    # Case 3: larger M, tile-aligned (exercises multi-tile "parallel" grid, G=2)
    B2, L2 = 2, 768
    keys2 = jax.random.split(jax.random.PRNGKey(1), N_INPUTS + 1)
    inputs2 = [jax.random.normal(k, (B2, L2, D), dtype=jnp.float32)
               for k in keys2[:-1]]
    sal2 = jax.random.normal(keys2[-1], (B2, L2), dtype=jnp.float32)
    res3 = jax.block_until_ready(
        saliency_head_forward(inputs2, sal2, params, pred_indices=(-1,)))
    ref3 = _reference_forward(inputs2, sal2, params, pred_indices=(-1,))
    assert jnp.allclose(res3, ref3, atol=1e-4, rtol=1e-4), "case3 mismatch"

    # Case 4: ragged M (M=300, not a multiple of 128) + multi-pred: exercises
    # the unpadded-x partial trailing block and the [:M] slice.
    B3, L3 = 3, 100
    keys3 = jax.random.split(jax.random.PRNGKey(2), N_INPUTS + 1)
    inputs3 = [jax.random.normal(k, (B3, L3, D), dtype=jnp.float32)
               for k in keys3[:-1]]
    sal3 = jax.random.normal(keys3[-1], (B3, L3), dtype=jnp.float32)
    res4 = jax.block_until_ready(
        saliency_head_forward(inputs3, sal3, params, pred_indices=(0, -1)))
    ref4 = _reference_forward(inputs3, sal3, params, pred_indices=(0, -1))
    assert jnp.allclose(res4, ref4, atol=1e-4, rtol=1e-4), "case4 mismatch"

    print("KERNEL_OK")
</pallas_src>

<mosaic_0001>
module attributes {stable_mosaic.version = 11 : i64} {
  func.func @kernel(%arg0: i32, %arg1: memref<1x128xf32, #tpu.memory_space<vmem>>, %arg2: memref<128x32xf32, #tpu.memory_space<vmem>>, %arg3: memref<32x32xf32, #tpu.memory_space<vmem>>, %arg4: memref<32x1xf32, #tpu.memory_space<vmem>>, %arg5: memref<1x32xf32, #tpu.memory_space<vmem>>, %arg6: memref<1x1xf32, #tpu.memory_space<vmem>>, %arg7: memref<1x128xf32, #tpu.memory_space<vmem>>) attributes {dimension_semantics = [#tpu.dimension_semantics<parallel>], iteration_bounds = array<i64: 1>, scalar_prefetch = 0 : i64, scratch_operands = 0 : i64, tpu.core_type = #tpu.core_type<tc>, window_params = [{transform_indices = @transform_0, window_bounds = array<i64: 1, 128>}, {transform_indices = @transform_1, window_bounds = array<i64: 128, 32>}, {pipeline_mode = #tpu.pipeline_mode<synchronous>, transform_indices = @transform_2, window_bounds = array<i64: 32, 32>}, {pipeline_mode = #tpu.pipeline_mode<synchronous>, transform_indices = @transform_3, window_bounds = array<i64: 32, 1>}, {pipeline_mode = #tpu.pipeline_mode<synchronous>, transform_indices = @transform_4, window_bounds = array<i64: 1, 32>}, {pipeline_mode = #tpu.pipeline_mode<synchronous>, transform_indices = @transform_5, window_bounds = array<i64: 1, 1>}, {transform_indices = @transform_6, window_bounds = array<i64: 1, 128>}]} {
    %c0 = arith.constant 0 : index
    %c0_0 = arith.constant 0 : index
    %0 = vector.load %arg3[%c0, %c0_0] : memref<32x32xf32, #tpu.memory_space<vmem>>, vector<32x32xf32>
    %c0_1 = arith.constant 0 : index
    %c0_2 = arith.constant 0 : index
    %1 = vector.load %arg4[%c0_1, %c0_2] : memref<32x1xf32, #tpu.memory_space<vmem>>, vector<32x1xf32>
    %c0_3 = arith.constant 0 : index
    %c0_4 = arith.constant 0 : index
    %2 = vector.load %arg5[%c0_3, %c0_4] : memref<1x32xf32, #tpu.memory_space<vmem>>, vector<1x32xf32>
    %c0_5 = arith.constant 0 : index
    %c0_6 = arith.constant 0 : index
    %3 = vector.load %arg6[%c0_5, %c0_6] : memref<1x1xf32, #tpu.memory_space<vmem>>, vector<1x1xf32>
    %c0_7 = arith.constant 0 : index
    %c0_8 = arith.constant 0 : index
    %4 = vector.load %arg2[%c0_7, %c0_8] : memref<128x32xf32, #tpu.memory_space<vmem>>, vector<128x32xf32>
    %cst = arith.constant dense<0.000000e+00> : vector<32x128xf32>
    %5 = tpu.matmul %0, %4, %cst {dimension_numbers = #tpu.dot_dimension_numbers<[1], [1], [0], [0], [0, 0, 1, 0], [], []>} : vector<32x32xf32>, vector<128x32xf32>, vector<32x128xf32> -> vector<32x128xf32>
    %6 = vector.broadcast %1 : vector<32x1xf32> to vector<32x128xf32>
    %7 = arith.addf %5, %6 : vector<32x128xf32>
    %cst_9 = arith.constant 0.000000e+00 : f32
    %8 = vector.broadcast %cst_9 : f32 to vector<32x128xf32>
    %9 = arith.maximumf %7, %8 : vector<32x128xf32>
    %cst_10 = arith.constant dense<0.000000e+00> : vector<1x128xf32>
    %10 = tpu.matmul %2, %9, %cst_10 {dimension_numbers = #tpu.dot_dimension_numbers<[1], [0], [0], [1], [0, 0, 1, 1], [], []>} : vector<1x32xf32>, vector<32x128xf32>, vector<1x128xf32> -> vector<1x128xf32>
    %11 = vector.broadcast %3 : vector<1x1xf32> to vector<1x128xf32>
    %12 = arith.addf %10, %11 : vector<1x128xf32>
    %13 = arith.negf %12 : vector<1x128xf32>
    %14 = math.exp %13 : vector<1x128xf32>
    %cst_11 = arith.constant 1.000000e+00 : f32
    %15 = vector.broadcast %cst_11 : f32 to vector<1x128xf32>
    %16 = arith.addf %15, %14 : vector<1x128xf32>
    %17 = arith.divf %15, %16 : vector<1x128xf32>
    %c0_12 = arith.constant 0 : index
    %c0_13 = arith.constant 0 : index
    %18 = vector.load %arg1[%c0_12, %c0_13] : memref<1x128xf32, #tpu.memory_space<vmem>>, vector<1x128xf32>
    %cst_14 = arith.constant 0.000000e+00 : f32
    %19 = vector.broadcast %cst_14 : f32 to vector<1x128xf32>
    %20 = arith.cmpf oge, %18, %19 : vector<1x128xf32>
    %cst_15 = arith.constant 1.000000e+00 : f32
    %cst_16 = arith.constant 0.000000e+00 : f32
    %21 = vector.broadcast %cst_15 : f32 to vector<1x128xf32>
    %22 = vector.broadcast %cst_16 : f32 to vector<1x128xf32>
    %23 = arith.select %20, %21, %22 : vector<1x128xi1>, vector<1x128xf32>
    %24 = arith.mulf %17, %23 : vector<1x128xf32>
    %c0_17 = arith.constant 0 : index
    %c0_18 = arith.constant 0 : index
    %25 = vector.load %arg7[%c0_17, %c0_18] : memref<1x128xf32, #tpu.memory_space<vmem>>, vector<1x128xf32>
    tpu.vector_store %arg7[%c0_17, %c0_18], %24 {strides = array<i32>} : memref<1x128xf32, #tpu.memory_space<vmem>>, vector<1x128xf32>,
    return
  }
  func.func @transform_0(%arg0: i32) -> (i32, i32) {
    %c0_i32 = arith.constant 0 : i32
    %c0_i32_0 = arith.constant 0 : i32
    return %arg0, %c0_i32 : i32, i32
  }
  func.func @transform_1(%arg0: i32) -> (i32, i32) {
    %c0_i32 = arith.constant 0 : i32
    %c0_i32_0 = arith.constant 0 : i32
    return %arg0, %c0_i32 : i32, i32
  }
  func.func @transform_2(%arg0: i32) -> (i32, i32) {
    %c0_i32 = arith.constant 0 : i32
    %c0_i32_0 = arith.constant 0 : i32
    %c0_i32_1 = arith.constant 0 : i32
    return %c0_i32, %c0_i32_0 : i32, i32
  }
  func.func @transform_3(%arg0: i32) -> (i32, i32) {
    %c0_i32 = arith.constant 0 : i32
    %c0_i32_0 = arith.constant 0 : i32
    %c0_i32_1 = arith.constant 0 : i32
    return %c0_i32, %c0_i32_0 : i32, i32
  }
  func.func @transform_4(%arg0: i32) -> (i32, i32) {
    %c0_i32 = arith.constant 0 : i32
    %c0_i32_0 = arith.constant 0 : i32
    %c0_i32_1 = arith.constant 0 : i32
    return %c0_i32, %c0_i32_0 : i32, i32
  }
  func.func @transform_5(%arg0: i32) -> (i32, i32) {
    %c0_i32 = arith.constant 0 : i32
    %c0_i32_0 = arith.constant 0 : i32
    %c0_i32_1 = arith.constant 0 : i32
    return %c0_i32, %c0_i32_0 : i32, i32
  }
  func.func @transform_6(%arg0: i32) -> (i32, i32) {
    %c0_i32 = arith.constant 0 : i32
    %c0_i32_0 = arith.constant 0 : i32
    return %arg0, %c0_i32 : i32, i32
  }
}

</mosaic_0001>

<bundles_post_ra>
// kernel: tpu_custom_call.1
= control target key start
LH: loop header
LB: loop body
LE: loop exit
PB: predicated region body
PF: predicated region fallthrough
CT: control target
= control target key end

     0   :  { %s699_s0 = inlined_call_operand.vmem [shape: f32[1,128], index: 0, kind: input, shape index: {}]   ;;  %s700_s1 = inlined_call_operand.hbm [shape: f32[16,32], index: 1, kind: input, shape index: {}]   ;;  %s701_s2 = inlined_call_operand.vmem [shape: f32[32,32], index: 2, kind: input, shape index: {}]   ;;  %s702_s3 = inlined_call_operand.vmem [shape: f32[32,1], index: 3, kind: input, shape index: {}]   ;;  %s703_s4 = inlined_call_operand.vmem [shape: f32[1,32], index: 4, kind: input, shape index: {}]   ;;  %s704_s5 = inlined_call_operand.<no memory space> [shape: f32[1,1], index: 5, kind: input, shape index: {}]   ;;  %s705_s6 = inlined_call_operand.hbm [shape: f32[1,128], index: 6, kind: output, shape index: {}]  }
   0x1   :  { %v11_v0 = vstv %s704_s5 }
   0x2   :  { %12 = vst [vmem:[#allocation2] sm:$0x1] %v11_v0 }
   0x3   :  { %13 = vsyncpa [#allocation4], 0 }
   0x4   :  { %14 = vsyncpa [#allocation5], 0 }
   0x5   :  { %21 = vsyncadd [#allocation4], 1792  ;;  %s556_s23 = smov [#allocation3]   ;;  %s508_s27 = scalar_lea.hbm %s700_s1, 256 }
   0x6   :  { %s22_s24 = sshll.u32 %s556_s23, 4  ;;  %p509_p0 = scmp.ne.s32.totalorder %s700_s1, %s508_s27  ;;  %s23_s24 = int_to_ptr.vmem [resolvable:$true] %s22_s24 }
   0x7   :  { %p512_p1 = scmp.lt.u32.totalorder %s508_s27, %s700_s1 }
   0x9   :  { %p514_p2 = pnand %p512_p1, %p509_p0 }
   0xb   :  { %517 = shalt.err (!%p514_p2)
}
   0xc   :  { %s518_s5 = scalar_lea.vmem %s23_s24, 256  ;;  %s522_s8 = scalar_lea.vmem %s23_s24, 2048 }
   0xd   :  { %p519_p3 = scmp.ne.s32.totalorder %s23_s24, %s518_s5  ;;  %p523_p4 = scmp.lt.s32.totalorder %s23_s24, %s23_s24 }
   0xe   :  { %p524_p5 = scmp.lt.s32.totalorder %s522_s8, %s518_s5 }
  0x10   :  { %p525_p6 = por %p524_p5, %p523_p4 }
  0x12   :  { %p526_p7 = pnand %p525_p6, %p519_p3 }
  0x14   :  { %529 = shalt.err (!%p526_p7)
}
  0x15   :  { %s557_s9 = smov 128   ;;  %s558_s10 = smov 8  }
  0x16   :  { %28 = dma.hbm_to_vmem [thread:$0]  %s700_s1, 256, %s23_s24, [#allocation4], %s557_s9, %s557_s9, %s558_s10  }
  0x17   :  { %552 = dma.done.wait [#allocation4], 2048  }
  0x18   :  { %553 = vsyncadd [#allocation4], 4294965248  ;;  %v559_v1 = vmov 0   ;;  %vm86_vm0 = vcmask 261120   ;;  %v50_v3 = vld [vmem:[#allocation3] sm:$0xff]  ;;  %v51_v4 = vld [vmem:[#allocation3 + $0x8] sm:$0xff]  ;;  %v241_v57 = vlaneseq }
  0x19   :  { %502 = vset.pattern.permute.xlu0 %v559_v1  ;;  %503 = vset.pattern.permute.xlu1 %v559_v1  ;;  %vm616_vm1 = vmpackc.low %vm86_vm0, %vm86_vm0  ;;  %v52_v5 = vld [vmem:[#allocation3 + $0x10] sm:$0xff]  ;;  %v440_v6 = vpack.c.bf16 %v51_v4, %v50_v3  ;;  %v53_v7 = vld [vmem:[#allocation3 + $0x18] sm:$0xff]  ;;  %v560_v36 = vmov 0.0|0.0   ;;  %vm561_vm2 = vmmov 0   ;;  %v562_v37 = vmov 0.0  }
  0x1a   :  { %v446_v8 = vpack.c.bf16 %v53_v7, %v52_v5  ;;  %v40_v9 = vld [vmem:[%s701_s2] sm:$0xff]  ;;  %v55_v11 = vld [vmem:[#allocation3 + $0x28] sm:$0xff]  ;;  %v47_v16 = vld [vmem:[%s702_s3 + $0x18] sm:$0xff]  ;;  %488 = vmatprep.subr.bf16.mxu1 %v560_v36  ;;  %437 = vmatprep.mubr.msk.f32.mxu1 %vm561_vm2, %v562_v37  ;;  %v242_v58 = vshrl.u32 %v241_v57, 7 }
  0x1b   :  { %442 = vmatprep.subr.msk.bf16.mxu0 %vm616_vm1, %v440_v6  ;;  %v54_v10 = vld [vmem:[#allocation3 + $0x20] sm:$0xff]  ;;  %423 = vmatprep.mubr.msk.f32.mxu0 %vm86_vm0, %v40_v9  ;;  %v46_v13 = vld [vmem:[%s702_s3 + $0x10] sm:$0xff]  ;;  %v49_v17 = vld [vmem:[#allocation2] sm:$0x1] }
  0x1c   :  { %445 = vmatpush3.bf16.xpose.msk.msra.mxu0 %vm616_vm1, %v440_v6  ;;  %v44_v12 = vld [vmem:[%s702_s3] sm:$0xff]  ;;  %v45_v14 = vld [vmem:[%s702_s3 + $0x8] sm:$0xff]  ;;  %78 = vperm.xlu1 %503, %v46_v13   ;;  %v452_v15 = vpack.c.bf16 %v55_v11, %v54_v10  ;;  %v56_v18 = vld [vmem:[#allocation3 + $0x30] sm:$0xff]  ;;  %v243_v59 = vsub.s32 0, %v242_v58 }
  0x1d   :  { %448 = vmatprep.subr.msk.bf16.mxu0 %vm616_vm1, %v446_v8  ;;  %68 = vperm.xlu0 %502, %v44_v12   ;;  %v57_v19 = vld [vmem:[#allocation3 + $0x38] sm:$0xff]  ;;  %v58_v21 = vld [vmem:[#allocation3 + $0x40] sm:$0xff]  ;;  %v59_v22 = vld [vmem:[#allocation3 + $0x48] sm:$0xff] }
  0x1e   :  { %v458_v20 = vpack.c.bf16 %v57_v19, %v56_v18  ;;  %v464_v23 = vpack.c.bf16 %v59_v22, %v58_v21  ;;  %v60_v24 = vld [vmem:[#allocation3 + $0x50] sm:$0xff]  ;;  %v61_v25 = vld [vmem:[#allocation3 + $0x58] sm:$0xff]  ;;  %v62_v27 = vld [vmem:[#allocation3 + $0x60] sm:$0xff] }
  0x1f   :  { %v470_v26 = vpack.c.bf16 %v61_v25, %v60_v24  ;;  %v63_v28 = vld [vmem:[#allocation3 + $0x68] sm:$0xff]  ;;  %v64_v30 = vld [vmem:[#allocation3 + $0x70] sm:$0xff]  ;;  %v65_v31 = vld [vmem:[#allocation3 + $0x78] sm:$0xff] }
  0x20   :  { %83 = vperm.xlu1 %503, %v47_v16   ;;  %v476_v29 = vpack.c.bf16 %v63_v28, %v62_v27  ;;  %v482_v32 = vpack.c.bf16 %v65_v31, %v64_v30  ;;  %v41_v33 = vld [vmem:[%s701_s2 + $0x8] sm:$0xff]  ;;  %v42_v34 = vld [vmem:[%s701_s2 + $0x10] sm:$0xff]  ;;  %v43_v35 = vld [vmem:[%s701_s2 + $0x18] sm:$0xff] }
  0x21   :  { %73 = vperm.xlu0 %502, %v45_v14   ;;  %v48_v56 = vld [vmem:[%s703_s4] sm:$0x1]  ;;  %s563_s4 = smov [#allocation6]  }
  0x22   :  { %v324_v4 = vld [vmem:[%s699_s0] sm:$0x1]  ;;  %s335_s30 = sshll.u32 %s563_s4, 4  ;;  %s336_s30 = int_to_ptr.vmem [resolvable:$true] %s335_s30 }
  0x23   :  { %vm325_vm3 = vcmp.ge.f32.partialorder %v324_v4, 0.0  ;;  %s530_s7 = scalar_lea.vmem %s336_s30, 16  ;;  %s534_s5 = scalar_lea.vmem %s336_s30, 32 }
  0x24   :  { %451 = vmatpush3.bf16.xpose.msk.msra.mxu0 %vm616_vm1, %v446_v8  ;;  %v326_v5 = vsel %vm325_vm3, 1.0, %v562_v37  ;;  %p531_p8 = scmp.ne.s32.totalorder %s336_s30, %s530_s7  ;;  %p535_p9 = scmp.lt.s32.totalorder %s336_s30, %s336_s30 }
  0x25   :  { %454 = vmatprep.subr.msk.bf16.mxu0 %vm616_vm1, %v452_v15  ;;  %238 = vperm.xlu0 %502, %v49_v17   ;;  %p536_p10 = scmp.lt.s32.totalorder %s534_s5, %s530_s7 }
  0x27   :  { %p537_p11 = por %p536_p10, %p535_p9 }
  0x29   :  { %p538_p12 = pnand %p537_p11, %p531_p8 }
  0x2c   :  { %457 = vmatpush3.bf16.xpose.msk.msra.mxu0 %vm616_vm1, %v452_v15 }
  0x2d   :  { %460 = vmatprep.subr.msk.bf16.mxu0 %vm616_vm1, %v458_v20 }
  0x34   :  { %463 = vmatpush3.bf16.xpose.msk.msra.mxu0 %vm616_vm1, %v458_v20 }
  0x35   :  { %466 = vmatprep.subr.msk.bf16.mxu0 %vm616_vm1, %v464_v23 }
  0x3c   :  { %469 = vmatpush3.bf16.xpose.msk.msra.mxu0 %vm616_vm1, %v464_v23 }
  0x3d   :  { %472 = vmatprep.subr.msk.bf16.mxu0 %vm616_vm1, %v470_v26 }
  0x44   :  { %475 = vmatpush3.bf16.xpose.msk.msra.mxu0 %vm616_vm1, %v470_v26 }
  0x45   :  { %478 = vmatprep.subr.msk.bf16.mxu0 %vm616_vm1, %v476_v29 }
  0x4c   :  { %481 = vmatpush3.bf16.xpose.msk.msra.mxu0 %vm616_vm1, %v476_v29 }
  0x4d   :  { %484 = vmatprep.subr.msk.bf16.mxu0 %vm616_vm1, %v482_v32 }
  0x54   :  { %487 = vmatpush3.bf16.xpose.msk.msra.mxu0 %vm616_vm1, %v482_v32 }
  0x5b   :  { %424 = vmatmul.mubr.msk.f32.vlgmr.msra.gmra.mrb[0].mxu0 %vm86_vm0, %v41_v33 }
  0x5c   :  { %426 = vmatprep.mubr.msk.f32.mxu0 %vm86_vm0, %v42_v34 }
  0x5f   :  { %427 = vmatmul.mubr.msk.f32.gmra.mrb[2].mxu0 %vm86_vm0, %v43_v35 }
  0x9b   :  { %v79_v39 = vpop.permute.xlu1 %78 }
  0x9c   :  { %v69_v38 = vpop.permute.xlu0 %68 }
  0x9f   :  { %v84_v46 = vpop.permute.xlu1 %83 }
  0xa0   :  { %v74_v40 = vpop.permute.xlu0 %73 }
  0xa4   :  { %v239_v60 = vpop.permute.xlu0 %238 }
  0xa5   :  { %v244_v61 = vrot.slane %v239_v60, %v243_v59 }
 0x12e   :  { %v425_v41 = vpop.f32.mrb[0].mxu0 }
 0x12f   :  { %v219_v42 = vadd.f32 %v425_v41, %v74_v40  ;;  %v213_v43 = vpop.f32.mrb[1].mxu0 }
 0x130   :  { %v214_v44 = vadd.f32 %v213_v43, %v69_v38 }
 0x131   :  { %v233_v45 = vmax.f32 %v219_v42, 0.0 }
 0x132   :  { %v232_v47 = vmax.f32 %v214_v44, 0.0  ;;  %v428_v48 = vpop.f32.mrb[2].mxu0 }
 0x133   :  { %v229_v49 = vadd.f32 %v428_v48, %v84_v46  ;;  %v223_v50 = vpop.f32.mrb[3].mxu0 }
 0x134   :  { %v224_v51 = vadd.f32 %v223_v50, %v79_v39  ;;  %v489_v52 = vpack.c.bf16 %v233_v45, %v232_v47 }
 0x135   :  { %v235_v53 = vmax.f32 %v229_v49, 0.0 }
 0x136   :  { %v234_v54 = vmax.f32 %v224_v51, 0.0  ;;  %490 = vmatpush3.bf16.msra.mxu1 %v489_v52 }
 0x137   :  { %491 = vmatprep.subr.bf16.mxu1 %v560_v36 }
 0x138   :  { %v492_v55 = vpack.c.bf16 %v235_v53, %v234_v54 }
 0x13a   :  { %493 = vmatpush3.bf16.msra.mxu1 %v492_v55 }
 0x13d   :  { %438 = vmatmul.mubr.msk.f32.vlgmr.msra.gmra.mrb[0].mxu1 %vm86_vm0, %v48_v56 }
 0x210   :  { %v314_v62 = vpop.f32.mrb[0].mxu1 }
 0x211   :  { %v315_v63 = vadd.f32 %v314_v62, %v244_v61  ;;  %v439_v0 = vpop.f32.mrb[1].mxu1 }
 0x213   :  { %v365_v1 = vmul.f32 -1.442695, %v315_v63 }
 0x215   :  { %504 = vpow2.f32 %v365_v1 }
 0x21f   :  { %v505_v2 = vpop.eup %504 }
 0x220   :  { %v321_v3 = vadd.f32 1.0, %v505_v2 }
 0x222   :  { %506 = vrcp.f32 %v321_v3 }
 0x22c   :  { %v507_v6 = vpop.eup %506 }
 0x22d   :  { %v327_v7 = vmul.f32 %v507_v6, %v326_v5 }
 0x22f   :  { %328 = vst [vmem:[#allocation6] sm:$0x1] %v327_v7 }
 0x230   :  { %541 = shalt.err (!%p538_p12)
}
 0x231   :  { %s542_s0 = scalar_lea.hbm %s705_s6, 16 }
 0x232   :  { %p543_p13 = scmp.ne.s32.totalorder %s705_s6, %s542_s0  ;;  %p546_p0 = scmp.lt.u32.totalorder %s542_s0, %s705_s6 }
 0x234   :  { %p548_p1 = pnand %p546_p0, %p543_p13 }
 0x236   :  { %551 = shalt.err (!%p548_p1)
}
 0x237   :  { %338 = dma.vmem_to_hbm [thread:$0]  %s336_s30, 16, %s705_s6, [#allocation5]  }
 0x238   :  { %554 = dma.done.wait [#allocation5], 16  }
 0x239   :  { %555 = vsyncadd [#allocation5], 4294967280 }
 0x23a   :  { %342 = vsyncpa [#allocation4], 1 }
 0x23b   :  { %343 = vsyncpa [#allocation5], 1 }

</bundles_post_ra>
